<compile_context>
chip_gen: v7x
topology: tpu7x:2x2x1
jax: 0.10.0
libtpu: 0.0.40
codegen_flags: <defaults>
</compile_context>

<pallas_src>
import jax
import jax.numpy as jnp
from jax.experimental import pallas as pl
from jax.experimental.pallas import tpu as pltpu

_NEG = -1e30  # bias padding for fake classes -> exp() underflows to 0 exactly


def _round_up(n, m):
    return ((n + m - 1) // m) * m


def _prelu(x, alpha):
    # PyTorch PReLU: x if x >= 0 else alpha * x
    return jnp.where(x >= 0, x, alpha * x)


def classification_net_kernel(x_ref, w1_ref, b1_ref, a1_ref,
                              w2_ref, b2_ref, anl_ref,
                              wfc_ref, bfc_ref, out_ref):
    x = x_ref[...]                                                        # (TB, D) f32

    # --- embedding_net: Linear(D, Hp) -> PReLU -> Linear(Hp, 2) --------------
    h = jnp.dot(x, w1_ref[...], preferred_element_type=jnp.float32)      # MXU
    h = h + b1_ref[...]                                                   # (TB, Hp)
    h = _prelu(h, a1_ref[0])                                              # scalar alpha (SMEM)

    emb = jnp.dot(h, w2_ref[...], preferred_element_type=jnp.float32)    # (TB, 2)
    emb = emb + b2_ref[...]

    # --- ClassificationNet.nonlinear (PReLU, single learnable alpha) ---------
    e = _prelu(emb, anl_ref[0])                                           # (TB, 2)

    # --- fc1: Linear(2, n_classes) as VPU outer-product (K=2: skip the MXU) --
    wfc = wfc_ref[...]                                                    # (2, Cp)
    logits = (e[:, 0:1] * wfc[0:1, :]
              + e[:, 1:2] * wfc[1:2, :]
              + bfc_ref[...])                                             # (TB, Cp)

    # --- numerically stable log_softmax over the class axis ------------------
    m = jnp.max(logits, axis=-1, keepdims=True)
    lse = m + jnp.log(jnp.sum(jnp.exp(logits - m), axis=-1, keepdims=True))
    out_ref[...] = (logits - lse).astype(out_ref.dtype)


def classification_net_forward(x, params, *, tile_batch=None):
    B, D = x.shape
    H = params["w1"].shape[1]
    C = params["wfc"].shape[1]

    Hp = _round_up(H, 128)          # lane-dense hidden dim
    Cp = _round_up(C, 128)          # lane-dense class dim (unmasked vst writeback)

    if tile_batch is None:
        tile_batch = 512
    TB = _round_up(min(tile_batch, _round_up(B, 8)), 8)
    num_tiles = -(-B // TB)
    Bp = num_tiles * TB

    # Exact zero-padding: padded hidden units contribute exactly 0; padded class
    # columns get weight 0 and bias -1e30, so exp() of their logits is exactly 0.
    xp = jnp.pad(x, ((0, Bp - B), (0, 0)))
    w1p = jnp.pad(params["w1"], ((0, 0), (0, Hp - H)))
    b1p = jnp.pad(params["b1"], ((0, 0), (0, Hp - H)))
    w2p = jnp.pad(params["w2"], ((0, Hp - H), (0, 0)))
    wfcp = jnp.pad(params["wfc"], ((0, 0), (0, Cp - C)))
    bfcp = jnp.pad(params["bfc"], ((0, 0), (0, Cp - C)), constant_values=_NEG)

    flops = 2 * Bp * (D * Hp + Hp * 2 + 2 * Cp)
    transcendentals = Bp * (Cp + 1)                     # exp per class + log per row
    bytes_accessed = 4 * (Bp * (D + Cp)                 # activations in/out
                          + D * Hp + Hp + Hp * 2 + 2 + 2 * Cp + Cp)   # weights

    smem = pl.BlockSpec(memory_space=pltpu.MemorySpace.SMEM)

    out = pl.pallas_call(
        classification_net_kernel,
        out_shape=jax.ShapeDtypeStruct((Bp, Cp), jnp.float32),
        grid=(num_tiles,),
        in_specs=[
            pl.BlockSpec((TB, D), lambda i: (i, 0)),     # x tile (pipelined)
            pl.BlockSpec((D, Hp), lambda i: (0, 0)),     # w1 (resident)
            pl.BlockSpec((1, Hp), lambda i: (0, 0)),     # b1
            smem,                                        # a1  PReLU alpha (1,)
            pl.BlockSpec((Hp, 2), lambda i: (0, 0)),     # w2
            pl.BlockSpec((1, 2), lambda i: (0, 0)),      # b2
            smem,                                        # anl PReLU alpha (1,)
            pl.BlockSpec((2, Cp), lambda i: (0, 0)),     # wfc
            pl.BlockSpec((1, Cp), lambda i: (0, 0)),     # bfc (padded with -1e30)
        ],
        out_specs=pl.BlockSpec((TB, Cp), lambda i: (i, 0)),
        compiler_params=pltpu.CompilerParams(
            dimension_semantics=("parallel",)),
        cost_estimate=pl.CostEstimate(
            flops=flops,
            transcendentals=transcendentals,
            bytes_accessed=bytes_accessed),
    )(xp, w1p, b1p, params["a1"], w2p, params["b2"], params["anl"],
      wfcp, bfcp)

    return out[:B, :C]


def init_params(key, in_dim, hidden, n_classes):
    k1, k2, k3, k4, k5, k6 = jax.random.split(key, 6)
    scale = 0.1
    return {
        # embedding_net weights (stored (in, out))
        "w1": scale * jax.random.normal(k1, (in_dim, hidden), jnp.float32),
        "b1": scale * jax.random.normal(k2, (1, hidden), jnp.float32),
        "a1": jnp.array([0.25], jnp.float32),      # nn.PReLU() default init
        "w2": scale * jax.random.normal(k3, (hidden, 2), jnp.float32),
        "b2": scale * jax.random.normal(k4, (1, 2), jnp.float32),
        # ClassificationNet.nonlinear
        "anl": jnp.array([0.25], jnp.float32),     # nn.PReLU() default init
        # fc1 = nn.Linear(2, n_classes)
        "wfc": scale * jax.random.normal(k5, (2, n_classes), jnp.float32),
        "bfc": scale * jax.random.normal(k6, (1, n_classes), jnp.float32),
    }


def reference_forward(x, p):
    h = x @ p["w1"] + p["b1"]
    h = jnp.where(h >= 0, h, p["a1"][0] * h)
    emb = h @ p["w2"] + p["b2"]
    e = jnp.where(emb >= 0, emb, p["anl"][0] * emb)
    logits = e @ p["wfc"] + p["bfc"]
    return jax.nn.log_softmax(logits, axis=-1)


if __name__ == "__main__":
    B, D, H, C = 20, 32, 32, 10   # B=20 with TB=8 exercises tiling + batch padding

    key = jax.random.PRNGKey(0)
    kx, kp = jax.random.split(key)
    x = jax.random.normal(kx, (B, D), jnp.float32)
    params = init_params(kp, D, H, C)

    scores = classification_net_forward(x, params, tile_batch=8)
    scores = jax.block_until_ready(scores)

    ref = reference_forward(x, params)
    assert scores.shape == (B, C)
    assert jnp.allclose(scores, ref, atol=1e-4, rtol=1e-4), "mismatch vs reference"
    # log_softmax rows should sum to ~1 in prob space
    assert jnp.allclose(jnp.sum(jnp.exp(scores), axis=-1), 1.0, atol=1e-4)

    print("KERNEL_OK")
</pallas_src>

<mosaic_0001>
module attributes {stable_mosaic.version = 11 : i64} {
  func.func @classification_net_kernel(%arg0: i32, %arg1: memref<8x32xf32, #tpu.memory_space<vmem>>, %arg2: memref<32x128xf32, #tpu.memory_space<vmem>>, %arg3: memref<1x128xf32, #tpu.memory_space<vmem>>, %arg4: memref<1xf32, #tpu.memory_space<smem>>, %arg5: memref<128x2xf32, #tpu.memory_space<vmem>>, %arg6: memref<1x2xf32, #tpu.memory_space<vmem>>, %arg7: memref<1xf32, #tpu.memory_space<smem>>, %arg8: memref<2x128xf32, #tpu.memory_space<vmem>>, %arg9: memref<1x128xf32, #tpu.memory_space<vmem>>, %arg10: memref<8x128xf32, #tpu.memory_space<vmem>>) attributes {dimension_semantics = [#tpu.dimension_semantics<parallel>], iteration_bounds = array<i64: 3>, scalar_prefetch = 0 : i64, scratch_operands = 0 : i64, tpu.core_type = #tpu.core_type<tc>, window_params = [{transform_indices = @transform_0, window_bounds = array<i64: 8, 32>}, {pipeline_mode = #tpu.pipeline_mode<synchronous>, transform_indices = @transform_1, window_bounds = array<i64: 32, 128>}, {pipeline_mode = #tpu.pipeline_mode<synchronous>, transform_indices = @transform_2, window_bounds = array<i64: 1, 128>}, {transform_indices = @transform_3, window_bounds = array<i64: 1>}, {pipeline_mode = #tpu.pipeline_mode<synchronous>, transform_indices = @transform_4, window_bounds = array<i64: 128, 2>}, {pipeline_mode = #tpu.pipeline_mode<synchronous>, transform_indices = @transform_5, window_bounds = array<i64: 1, 2>}, {transform_indices = @transform_6, window_bounds = array<i64: 1>}, {pipeline_mode = #tpu.pipeline_mode<synchronous>, transform_indices = @transform_7, window_bounds = array<i64: 2, 128>}, {pipeline_mode = #tpu.pipeline_mode<synchronous>, transform_indices = @transform_8, window_bounds = array<i64: 1, 128>}, {transform_indices = @transform_9, window_bounds = array<i64: 8, 128>}]} {
    %c0 = arith.constant 0 : index
    %c0_0 = arith.constant 0 : index
    %0 = vector.load %arg1[%c0, %c0_0] : memref<8x32xf32, #tpu.memory_space<vmem>>, vector<8x32xf32>
    %c0_1 = arith.constant 0 : index
    %c0_2 = arith.constant 0 : index
    %1 = vector.load %arg2[%c0_1, %c0_2] : memref<32x128xf32, #tpu.memory_space<vmem>>, vector<32x128xf32>
    %cst = arith.constant dense<0.000000e+00> : vector<8x128xf32>
    %2 = tpu.matmul %0, %1, %cst {dimension_numbers = #tpu.dot_dimension_numbers<[1], [0], [0], [1], [0, 0, 1, 1], [], []>} : vector<8x32xf32>, vector<32x128xf32>, vector<8x128xf32> -> vector<8x128xf32>
    %c0_3 = arith.constant 0 : index
    %c0_4 = arith.constant 0 : index
    %3 = vector.load %arg3[%c0_3, %c0_4] : memref<1x128xf32, #tpu.memory_space<vmem>>, vector<1x128xf32>
    %4 = vector.broadcast %3 : vector<1x128xf32> to vector<8x128xf32>
    %5 = arith.addf %2, %4 : vector<8x128xf32>
    %c0_5 = arith.constant 0 : index
    %6 = memref.load %arg4[%c0_5] : memref<1xf32, #tpu.memory_space<smem>>
    %cst_6 = arith.constant 0.000000e+00 : f32
    %7 = vector.broadcast %cst_6 : f32 to vector<8x128xf32>
    %8 = arith.cmpf oge, %5, %7 : vector<8x128xf32>
    %9 = vector.broadcast %6 : f32 to vector<8x128xf32>
    %10 = arith.mulf %9, %5 : vector<8x128xf32>
    %11 = arith.select %8, %5, %10 : vector<8x128xi1>, vector<8x128xf32>
    %c0_7 = arith.constant 0 : index
    %c0_8 = arith.constant 0 : index
    %12 = vector.load %arg5[%c0_7, %c0_8] : memref<128x2xf32, #tpu.memory_space<vmem>>, vector<128x2xf32>
    %cst_9 = arith.constant dense<0.000000e+00> : vector<8x2xf32>
    %13 = tpu.matmul %11, %12, %cst_9 {dimension_numbers = #tpu.dot_dimension_numbers<[1], [0], [0], [1], [0, 0, 1, 1], [], []>} : vector<8x128xf32>, vector<128x2xf32>, vector<8x2xf32> -> vector<8x2xf32>
    %c0_10 = arith.constant 0 : index
    %c0_11 = arith.constant 0 : index
    %14 = vector.load %arg6[%c0_10, %c0_11] : memref<1x2xf32, #tpu.memory_space<vmem>>, vector<1x2xf32>
    %15 = vector.broadcast %14 : vector<1x2xf32> to vector<8x2xf32>
    %16 = arith.addf %13, %15 : vector<8x2xf32>
    %c0_12 = arith.constant 0 : index
    %17 = memref.load %arg7[%c0_12] : memref<1xf32, #tpu.memory_space<smem>>
    %cst_13 = arith.constant 0.000000e+00 : f32
    %18 = vector.broadcast %cst_13 : f32 to vector<8x2xf32>
    %19 = arith.cmpf oge, %16, %18 : vector<8x2xf32>
    %20 = vector.broadcast %17 : f32 to vector<8x2xf32>
    %21 = arith.mulf %20, %16 : vector<8x2xf32>
    %22 = arith.select %19, %16, %21 : vector<8x2xi1>, vector<8x2xf32>
    %c0_14 = arith.constant 0 : index
    %c0_15 = arith.constant 0 : index
    %23 = vector.load %arg8[%c0_14, %c0_15] : memref<2x128xf32, #tpu.memory_space<vmem>>, vector<2x128xf32>
    %24 = vector.extract_strided_slice %22 {offsets = [0, 0], sizes = [8, 1], strides = [1, 1]} : vector<8x2xf32> to vector<8x1xf32>
    %25 = vector.extract_strided_slice %23 {offsets = [0, 0], sizes = [1, 128], strides = [1, 1]} : vector<2x128xf32> to vector<1x128xf32>
    %26 = vector.broadcast %24 : vector<8x1xf32> to vector<8x128xf32>
    %27 = vector.broadcast %25 : vector<1x128xf32> to vector<8x128xf32>
    %28 = arith.mulf %26, %27 : vector<8x128xf32>
    %29 = vector.extract_strided_slice %22 {offsets = [0, 1], sizes = [8, 1], strides = [1, 1]} : vector<8x2xf32> to vector<8x1xf32>
    %30 = vector.extract_strided_slice %23 {offsets = [1, 0], sizes = [1, 128], strides = [1, 1]} : vector<2x128xf32> to vector<1x128xf32>
    %31 = vector.broadcast %29 : vector<8x1xf32> to vector<8x128xf32>
    %32 = vector.broadcast %30 : vector<1x128xf32> to vector<8x128xf32>
    %33 = arith.mulf %31, %32 : vector<8x128xf32>
    %34 = arith.addf %28, %33 : vector<8x128xf32>
    %c0_16 = arith.constant 0 : index
    %c0_17 = arith.constant 0 : index
    %35 = vector.load %arg9[%c0_16, %c0_17] : memref<1x128xf32, #tpu.memory_space<vmem>>, vector<1x128xf32>
    %36 = vector.broadcast %35 : vector<1x128xf32> to vector<8x128xf32>
    %37 = arith.addf %34, %36 : vector<8x128xf32>
    %cst_18 = arith.constant dense<0xFF800000> : vector<8xf32>
    %38 = vector.multi_reduction <maximumf>, %37, %cst_18 [1] : vector<8x128xf32> to vector<8xf32>
    %39 = vector.shape_cast %38 : vector<8xf32> to vector<8x1xf32>
    %40 = vector.broadcast %39 : vector<8x1xf32> to vector<8x128xf32>
    %41 = arith.subf %37, %40 : vector<8x128xf32>
    %42 = math.exp %41 : vector<8x128xf32>
    %cst_19 = arith.constant dense<0.000000e+00> : vector<8xf32>
    %43 = vector.multi_reduction <add>, %42, %cst_19 [1] : vector<8x128xf32> to vector<8xf32>
    %44 = vector.shape_cast %43 : vector<8xf32> to vector<8x1xf32>
    %45 = math.log %44 : vector<8x1xf32>
    %46 = arith.addf %39, %45 : vector<8x1xf32>
    %47 = vector.broadcast %46 : vector<8x1xf32> to vector<8x128xf32>
    %48 = arith.subf %37, %47 : vector<8x128xf32>
    %c0_20 = arith.constant 0 : index
    %c0_21 = arith.constant 0 : index
    %49 = vector.load %arg10[%c0_20, %c0_21] : memref<8x128xf32, #tpu.memory_space<vmem>>, vector<8x128xf32>
    tpu.vector_store %arg10[%c0_20, %c0_21], %48 {strides = array<i32>} : memref<8x128xf32, #tpu.memory_space<vmem>>, vector<8x128xf32>,
    return
  }
  func.func @transform_0(%arg0: i32) -> (i32, i32) {
    %c0_i32 = arith.constant 0 : i32
    %c0_i32_0 = arith.constant 0 : i32
    return %arg0, %c0_i32 : i32, i32
  }
  func.func @transform_1(%arg0: i32) -> (i32, i32) {
    %c0_i32 = arith.constant 0 : i32
    %c0_i32_0 = arith.constant 0 : i32
    %c0_i32_1 = arith.constant 0 : i32
    return %c0_i32, %c0_i32_0 : i32, i32
  }
  func.func @transform_2(%arg0: i32) -> (i32, i32) {
    %c0_i32 = arith.constant 0 : i32
    %c0_i32_0 = arith.constant 0 : i32
    %c0_i32_1 = arith.constant 0 : i32
    return %c0_i32, %c0_i32_0 : i32, i32
  }
  func.func @transform_3(%arg0: i32) -> i32 {
    %c0_i32 = arith.constant 0 : i32
    %c0_i32_0 = arith.constant 0 : i32
    return %c0_i32 : i32
  }
  func.func @transform_4(%arg0: i32) -> (i32, i32) {
    %c0_i32 = arith.constant 0 : i32
    %c0_i32_0 = arith.constant 0 : i32
    %c0_i32_1 = arith.constant 0 : i32
    return %c0_i32, %c0_i32_0 : i32, i32
  }
  func.func @transform_5(%arg0: i32) -> (i32, i32) {
    %c0_i32 = arith.constant 0 : i32
    %c0_i32_0 = arith.constant 0 : i32
    %c0_i32_1 = arith.constant 0 : i32
    return %c0_i32, %c0_i32_0 : i32, i32
  }
  func.func @transform_6(%arg0: i32) -> i32 {
    %c0_i32 = arith.constant 0 : i32
    %c0_i32_0 = arith.constant 0 : i32
    return %c0_i32 : i32
  }
  func.func @transform_7(%arg0: i32) -> (i32, i32) {
    %c0_i32 = arith.constant 0 : i32
    %c0_i32_0 = arith.constant 0 : i32
    %c0_i32_1 = arith.constant 0 : i32
    return %c0_i32, %c0_i32_0 : i32, i32
  }
  func.func @transform_8(%arg0: i32) -> (i32, i32) {
    %c0_i32 = arith.constant 0 : i32
    %c0_i32_0 = arith.constant 0 : i32
    %c0_i32_1 = arith.constant 0 : i32
    return %c0_i32, %c0_i32_0 : i32, i32
  }
  func.func @transform_9(%arg0: i32) -> (i32, i32) {
    %c0_i32 = arith.constant 0 : i32
    %c0_i32_0 = arith.constant 0 : i32
    return %arg0, %c0_i32 : i32, i32
  }
}

</mosaic_0001>

<bundles_post_ra>
// kernel: tpu_custom_call.1
= control target key start
LH: loop header
LB: loop body
LE: loop exit
PB: predicated region body
PF: predicated region fallthrough
CT: control target
= control target key end

     0   :  { %s1093_s0 = inlined_call_operand.vmem [shape: f32[24,32], index: 0, kind: input, shape index: {}]   ;;  %s1094_s1 = inlined_call_operand.vmem [shape: f32[32,128], index: 1, kind: input, shape index: {}]   ;;  %s1095_s2 = inlined_call_operand.vmem [shape: f32[1,128], index: 2, kind: input, shape index: {}]   ;;  %s1096_s3 = inlined_call_operand.<no memory space> [shape: f32[1], index: 3, kind: input, shape index: {}]   ;;  %s1097_s4 = inlined_call_operand.vmem [shape: f32[128,2], index: 4, kind: input, shape index: {}]   ;;  %s1098_s5 = inlined_call_operand.vmem [shape: f32[1,2], index: 5, kind: input, shape index: {}]   ;;  %s1099_s6 = inlined_call_operand.<no memory space> [shape: f32[1], index: 6, kind: input, shape index: {}]   ;;  %s1100_s7 = inlined_call_operand.vmem [shape: f32[2,128], index: 7, kind: input, shape index: {}]   ;;  %s1101_s8 = inlined_call_operand.vmem [shape: f32[1,128], index: 8, kind: input, shape index: {}]   ;;  %s1102_s9 = inlined_call_operand.hbm [shape: f32[24,128], index: 9, kind: output, shape index: {}]  }
   0x1   :  { %14 = sst [smem:[#allocation2]] %s1096_s3 }
   0x2   :  { %15 = sst [smem:[#allocation3]] %s1099_s6 }
   0x3   :  { %16 = vsyncpa [#allocation5], 0 }
   0x4   :  { %18 = vsyncpa [#allocation5 + $0x1], 0  ;;  %s921_s13 = smov 0   ;;  %s923_s14 = smov 0  }
   0x5   :  { %s925_s15 = smov 0   ;;  %s927_s16 = smov 0  }
   0x6 LB: > { %s942_s3 = sadd.s32 4294967295, %s857_s16   ;;  %s633_s6 = sadd.s32 4294967294, %s857_s16   ;;  %s857_s16 = sphi %s927_s16, %s1108_s16   ;;  %s853_s15 = sphi %s925_s15, %s1107_s15   ;;  %s849_s14 = sphi %s923_s14, %s1106_s14   ;;  %s845_s13 = sphi %s921_s13, %s1105_s13  }
   0x7   : > { %s946_s17 = sadd.s32 1, %s857_s16   ;;  %s225_s18 = sadd.s32 1, %s853_s15 }
   0x8   : > { %s222_s19 = ssub.s32 %s857_s16, %s946_s17  ;;  %p235_p0 = scmp.ne.s32.totalorder %s853_s15, %s849_s14 }
   0x9   : > { %p223_p1 = scmp.eq.s32.totalorder %s222_s19, 0  ;;  %p236_p2 = scmp.eq.s32.totalorder %s942_s3, 2 }
   0xa   : > { %p241_p3 = scmp.ne.s32.totalorder %s849_s14, %s845_s13  ;;  %p242_p4 = scmp.eq.s32.totalorder %s633_s6, 2 }
   0xb   : > { %s957_s20 = scalar_select %p223_p1, %s853_s15, %s225_s18  }
   0xc   : > { %p959_p5 = por %p236_p2, %p235_p0  ;;  %p963_p6 = por %p242_p4, %p241_p3 }
   0xd   : > { %p636_p7 = scmp.ge.s32.totalorder %s857_s16, 1  ;;  %p291_p8 = scmp.lt.s32.totalorder %s857_s16, 4 }
   0xf   : > { %p292_p9 = pnand %p636_p7, %p291_p8 }
  0x10   : > { %v331_v0 = vld [vmem:[%s1094_s1] sm:$0xff] (!%p292_p9)  ;;  %v332_v1 = vld [vmem:[%s1094_s1 + $0x8] sm:$0xff] (!%p292_p9)  ;;  %v333_v2 = vld [vmem:[%s1094_s1 + $0x10] sm:$0xff] (!%p292_p9)  ;;  %v859_v3 = vmov (!%p292_p9), 0.0|0.0   ;;  %vm860_vm0 = vmmov (!%p292_p9), 0   ;;  %v861_v6 = vmov (!%p292_p9), 0.0   ;;  %v525_v49 = vlaneseq (!%p292_p9) }
  0x11   : > { %295 = sbr.rel (%p292_p9) target bundleno = 932 (0x3a4), region = 56  ;;  %715 = vmatprep.subr.bf16.mxu0 (!%p292_p9), %v859_v3  ;;  %v716_v4 = vpack.c.bf16 (!%p292_p9), %v332_v1, %v331_v0  ;;  %v334_v5 = vld [vmem:[%s1094_s1 + $0x18] sm:$0xff] (!%p292_p9)  ;;  %677 = vmatprep.mubr.msk.f32.mxu0 (!%p292_p9), %vm860_vm0, %v861_v6  ;;  %p326_p10 = scmp.lt.s32.totalorder (!%p292_p9), %s942_s3, 2  ;;  %v421_v7 = vld [vmem:[%s1097_s4] sm:$0xff] (!%p292_p9)  ;;  %v422_v8 = vld [vmem:[%s1097_s4 + $0x8] sm:$0xff] (!%p292_p9)  ;;  %vm342_vm1 = vcmask (!%p292_p9), 261120  }
  0x12   : > { %721 = vmatprep.subr.bf16.mxu1 (!%p292_p9), %v859_v3  ;;  %v722_v9 = vpack.c.bf16 (!%p292_p9), %v422_v8, %v421_v7  ;;  %v423_v10 = vld [vmem:[%s1097_s4 + $0x10] sm:$0xff] (!%p292_p9)  ;;  %v424_v11 = vld [vmem:[%s1097_s4 + $0x18] sm:$0xff] (!%p292_p9)  ;;  %712 = vmatprep.mubr.msk.f32.mxu1 (!%p292_p9), %vm860_vm0, %v861_v6  ;;  %v719_v12 = vpack.c.bf16 (!%p292_p9), %v334_v5, %v333_v2  ;;  %v425_v14 = vld [vmem:[%s1097_s4 + $0x20] sm:$0xff] (!%p292_p9)  ;;  %v862_v40 = vmov (!%p292_p9), 0   ;;  %s514_s29 = sld [smem:[#allocation3]] (!%p292_p9)  ;;  %v863_v48 = vmov (!%p292_p9), 1  }
  0x13   : > { %717 = vmatpush3.bf16.msra.mxu0 (!%p292_p9), %v716_v4  ;;  %v725_v13 = vpack.c.bf16 (!%p292_p9), %v424_v11, %v423_v10  ;;  %v426_v15 = vld [vmem:[%s1097_s4 + $0x28] sm:$0xff] (!%p292_p9)  ;;  %v427_v18 = vld [vmem:[%s1097_s4 + $0x30] sm:$0xff] (!%p292_p9)  ;;  %v428_v19 = vld [vmem:[%s1097_s4 + $0x38] sm:$0xff] (!%p292_p9)  ;;  %789 = vset.pattern.permute.xlu0 (!%p292_p9), %v862_v40  ;;  %v526_v50 = vshrl.u32 (!%p292_p9), %v525_v49, 7  ;;  %s323_s19 = sand.u32 (!%p292_p9), 1, %s849_s14   ;;  %s644_s24 = sshll.u32 (!%p292_p9), %s942_s3, 7 }
  0x14   : > { %718 = vmatprep.subr.bf16.mxu0 (!%p292_p9), %v859_v3  ;;  %723 = vmatpush3.bf16.msra.mxu1 (!%p292_p9), %v722_v9  ;;  %v728_v17 = vpack.c.bf16 (!%p292_p9), %v426_v15, %v425_v14  ;;  %v731_v20 = vpack.c.bf16 (!%p292_p9), %v428_v19, %v427_v18  ;;  %v429_v21 = vld [vmem:[%s1097_s4 + $0x40] sm:$0xff] (!%p292_p9)  ;;  %v430_v22 = vld [vmem:[%s1097_s4 + $0x48] sm:$0xff] (!%p292_p9)  ;;  %v431_v24 = vld [vmem:[%s1097_s4 + $0x50] sm:$0xff] (!%p292_p9)  ;;  %s637_s23 = sshll.u32 (!%p292_p9), %s323_s19, 3  ;;  %s561_s30 = scalar_lea.sflag (!%p292_p9), [#allocation5], %s323_s19 }
  0x15   : > { %724 = vmatprep.subr.bf16.mxu1 (!%p292_p9), %v859_v3  ;;  %v734_v23 = vpack.c.bf16 (!%p292_p9), %v430_v22, %v429_v21  ;;  %v432_v25 = vld [vmem:[%s1097_s4 + $0x58] sm:$0xff] (!%p292_p9)  ;;  %v433_v27 = vld [vmem:[%s1097_s4 + $0x60] sm:$0xff] (!%p292_p9)  ;;  %v434_v28 = vld [vmem:[%s1097_s4 + $0x68] sm:$0xff] (!%p292_p9)  ;;  %v527_v51 = vsub.s32 (!%p292_p9), 0, %v526_v50  ;;  %v536_v52 = vsub.s32 (!%p292_p9), 1, %v526_v50 }
  0x16   : > { %v737_v26 = vpack.c.bf16 (!%p292_p9), %v432_v25, %v431_v24  ;;  %v740_v29 = vpack.c.bf16 (!%p292_p9), %v434_v28, %v433_v27  ;;  %v435_v30 = vld [vmem:[%s1097_s4 + $0x70] sm:$0xff] (!%p292_p9)  ;;  %v436_v31 = vld [vmem:[%s1097_s4 + $0x78] sm:$0xff] (!%p292_p9)  ;;  %v639_v33 = vld [vmem:[%s1095_s2] ss:$0 sm:$0xff] (!%p292_p9) }
  0x17   : > { %720 = vmatpush3.bf16.msra.mxu0 (!%p292_p9), %v719_v12  ;;  %v743_v32 = vpack.c.bf16 (!%p292_p9), %v436_v31, %v435_v30  ;;  %v641_v41 = vld [vmem:[%s1098_s5] ss:$0 sm:$0xff] (!%p292_p9) }
  0x18   : > { %s327_s25 = scalar_select %p326_p10, %s942_s3, 2  ;;  %726 = vmatpush3.bf16.msra.mxu1 %v725_v13  ;;  %v516_v43 = vstv %s514_s29  ;;  %v519_v53 = vld [vmem:[%s1100_s7] sm:$0x3] }
  0x19   : > { %727 = vmatprep.subr.bf16.mxu1 %v859_v3  ;;  %v528_v55 = vrot.slane %v519_v53, %v527_v51  ;;  %v537_v56 = vrot.slane %v519_v53, %v536_v52  ;;  %v642_v60 = vld [vmem:[%s1101_s8] ss:$0 sm:$0xff]  ;;  %s1051_s29 = scalar_lea.hbm %s1102_s9, %s644_s24  ;;  %s864_s3 = smov [#allocation4]  }
  0x1a   : > { %s638_s26 = sshll.u32 %s327_s25, 3  ;;  %s325_s25 = scalar_lea.vmem [#allocation4], %s637_s23 }
  0x1b   : > { %s329_s12 = scalar_lea.vmem %s1093_s0, %s638_s26  ;;  %s416_s26 = sld [smem:[#allocation2]] }
  0x1c   : > { %v330_v16 = vld [vmem:[%s329_s12] sm:$0xff]  ;;  %729 = vmatpush3.bf16.msra.mxu1 %v728_v17  ;;  %s799_s11 = sshll.u32 %s864_s3, 4  ;;  %s800_s11 = int_to_ptr.vmem [resolvable:$false] %s799_s11 }
  0x1d   : > { %678 = vmatmul.mubr.msk.f32.vlgmr.msra.gmra.mrb[0].mxu0 %vm342_vm1, %v330_v16  ;;  %730 = vmatprep.subr.bf16.mxu1 %v859_v3  ;;  %s801_s12 = scalar_lea.vmem %s800_s11, 256 }
  0x20   : > { %732 = vmatpush3.bf16.msra.mxu1 %v731_v20 }
  0x21   : > { %733 = vmatprep.subr.bf16.mxu1 %v859_v3  ;;  %v418_v35 = vstv %s416_s26  ;;  %s574_s26 = sshll.u32 %s325_s25, 4  ;;  %s1053_s26 = int_to_ptr.vmem [resolvable:$true] %s574_s26 }
  0x22   : > { %s795_s10 = scalar_lea.vmem %s1053_s26, 128  ;;  %p802_p0 = scmp.lt.s32.totalorder %s1053_s26, %s800_s11 }
  0x23   : > { %p796_p11 = scmp.ne.s32.totalorder %s1053_s26, %s795_s10  ;;  %p803_p1 = scmp.lt.s32.totalorder %s801_s12, %s795_s10 }
  0x24   : > { %735 = vmatpush3.bf16.msra.mxu1 %v734_v23 }
  0x25   : > { %736 = vmatprep.subr.bf16.mxu1 %v859_v3  ;;  %p797_p12 = pnand %p796_p11, %p959_p5  ;;  %p804_p2 = por %p803_p1, %p802_p0 }
  0x27   : > { %p798_p13 = pneg %p797_p12 }
  0x28   : > { %738 = vmatpush3.bf16.msra.mxu1 %v737_v26 }
  0x29   : > { %739 = vmatprep.subr.bf16.mxu1 %v859_v3  ;;  %p805_p3 = pnand %p804_p2, %p798_p13 }
  0x2c   : > { %741 = vmatpush3.bf16.msra.mxu1 %v740_v29 }
  0x2d   : > { %742 = vmatprep.subr.bf16.mxu1 %v859_v3 }
  0x30   : > { %744 = vmatpush3.bf16.msra.mxu1 %v743_v32 }
  0xf0   : > { %v412_v34 = vpop.f32.mrb[0].mxu0 }
  0xf1   : > { %v413_v36 = vadd.f32 %v639_v33, %v412_v34  ;;  %v679_v37 = vpop.f32.mrb[1].mxu0 }
  0xf3   : > { %v419_v38 = vmul.f32 %v418_v35, %v413_v36  ;;  %vm417_vm2 = vcmp.ge.f32.partialorder %v413_v36, 0.0 }
  0xf5   : > { %v420_v39 = vsel %vm417_vm2, %v413_v36, %v419_v38 }
  0xf6   : > { %713 = vmatmul.mubr.f32.vlgmr.msra.gmra.mrb[0].mxu1 %v420_v39 }
 0x1c9   : > { %v510_v42 = vpop.f32.mrb[0].mxu1 }
 0x1ca   : > { %v511_v44 = vadd.f32 %v641_v41, %v510_v42  ;;  %v714_v45 = vpop.f32.mrb[1].mxu1 }
 0x1cc   : > { %vm515_vm3 = vcmp.ge.f32.partialorder %v511_v44, 0.0  ;;  %v517_v46 = vmul.f32 %v516_v43, %v511_v44 }
 0x1ce   : > { %v518_v47 = vsel %vm515_vm3, %v511_v44, %v517_v46 }
 0x1cf   : > { %522 = vperm.xlu0 %789, %v518_v47  }
 0x1d3   : > { %790 = vset.pattern.permute.xlu0 %v863_v48 }
 0x1d4   : > { %531 = vperm.xlu0 %790, %v518_v47  }
 0x24e   : > { %v523_v54 = vpop.permute.xlu0 %522 }
 0x24f   : > { %v529_v58 = vmul.f32 %v528_v55, %v523_v54 }
 0x253   : > { %v532_v57 = vpop.permute.xlu0 %531 }
 0x254   : > { %v538_v59 = vmul.f32 %v537_v56, %v532_v57 }
 0x256   : > { %v539_v61 = vadd.f32 %v538_v59, %v529_v58 }
 0x258   : > { %v547_v62 = vadd.f32 %v642_v60, %v539_v61 }
 0x25a   : > { %548 = vmax.xlane.f32.xlu1 %v547_v62 }
 0x2e7   : > { %v549_v63 = vpop.xlane.xlu1 %548 }
 0x2e8   : > { %v550_v0 = vsub.f32 %v547_v62, %v549_v63 }
 0x2ea   : > { %v551_v1 = vmul.f32 1.442695, %v550_v0 }
 0x2ec   : > { %791 = vpow2.f32 %v551_v1 }
 0x2f6   : > { %v792_v2 = vpop.eup %791 }
 0x2f7   : > { %553 = vadd.xlane.f32.xlu1 %v792_v2 }
 0x384   : > { %v554_v3 = vpop.xlane.xlu1 %553 }
 0x385   : > { %793 = vlog2.f32 %v554_v3 }
 0x38f   : > { %v794_v4 = vpop.eup %793 }
 0x390   : > { %v556_v5 = vmul.f32 0.6931472, %v794_v4 }
 0x392   : > { %v557_v6 = vadd.f32 %v556_v5, %v549_v63 }
 0x394   : > { %v558_v7 = vsub.f32 %v547_v62, %v557_v6 }
 0x396   : > { %559 = vst [vmem:[%s325_s25] sm:$0xff] %v558_v7 }
 0x397   : > { %808 = shalt.err (!%p805_p3)
}
 0x398   : > { %s809_s6 = scalar_lea.hbm %s1051_s29, 128  ;;  %s813_s23 = scalar_lea.hbm %s1102_s9, 384 }
 0x399   : > { %p810_p4 = scmp.ne.s32.totalorder %s1051_s29, %s809_s6  ;;  %p814_p9 = scmp.lt.u32.totalorder %s1051_s29, %s1102_s9 }
 0x39a   : > { %p815_p10 = scmp.lt.u32.totalorder %s813_s23, %s809_s6  ;;  %p817_p12 = scmp.lt.u32.totalorder %s809_s6, %s1051_s29 }
 0x39b   : > { %p811_p7 = pnand %p810_p4, %p959_p5 }
 0x39c   : > { %p816_p11 = por %p815_p10, %p814_p9 }
 0x39d   : > { %p812_p8 = pneg %p811_p7 }
 0x39e   : > { %p818_p13 = por %p817_p12, %p816_p11 }
 0x3a0   : > { %p819_p0 = pnand %p818_p13, %p812_p8 }
 0x3a2   : > { %822 = shalt.err (!%p819_p0)
}
 0x3a3   : > { %745 = dma.vmem_to_hbm [thread:$0]  (%p959_p5), %s1053_s26, 128, %s1051_s29, %s561_s30  }
 0x3a4 PF: > { %p751_p1 = scmp.ge.s32.totalorder %s857_s16, 2  ;;  %s586_s27 = sand.u32 1, %s845_s13  }
 0x3a5   : > { %s587_s28 = scalar_lea.sflag [#allocation5], %s586_s27 }
 0x3a6   : > { %p748_p2 = pnand %p751_p1, %p963_p6 }
 0x3a8   : > { %840 = dma.done.wait (!%p748_p2), %s587_s28, 128  }
 0x3a9   : > { %842 = vsyncadd (!%p748_p2), %s587_s28, 4294967168  ;;  %p21_p3 = scmp.ge.s32.totalorder %s946_s17, 5   ;;  %s1105_s13 = smov %s849_s14 }
 0x3aa   : > { %s1106_s14 = smov %s853_s15  ;;  %s1107_s15 = smov %s957_s20 }
 0x3ab   : > { %s1108_s16 = smov %s946_s17  ;;  %23 = sbr.rel (!%p21_p3) target bundleno = 6 (0x6), region = 91 }
 0x3b2   :  { %592 = vsyncpa [#allocation5], 1 }
 0x3b3   :  { %594 = vsyncpa [#allocation5 + $0x1], 1 }

</bundles_post_ra>
